<compile_context>
chip_gen: v6e
topology: v6e:2x2x1
jax: 0.10.0
libtpu: 0.0.40
codegen_flags: <defaults>
</compile_context>

<pallas_src>
import functools

import jax
import jax.numpy as jnp
from jax import lax
from jax.experimental import pallas as pl
from jax.experimental.pallas import tpu as pltpu


def _batcher_comparators(n):
    """Comparator list (i, j), i < j, of a Batcher odd-even mergesort network."""
    comps = []
    p = 1
    while p < n:
        q = p
        while q >= 1:
            j = q % p
            while j <= n - 1 - q:
                for i in range(min(q, n - j - q)):
                    if (i + j) // (2 * p) == (i + j + q) // (2 * p):
                        comps.append((i + j, i + j + q))
                j += 2 * q
            q //= 2
        p *= 2
    return comps


def _divisors(n):
    ds = []
    i = 1
    while i * i <= n:
        if n % i == 0:
            ds.append(i)
            if i != n // i:
                ds.append(n // i)
        i += 1
    return ds


def _choose_lane_dim(L, k, itemsize):
    """Pick Q | L (so (B,k,L) -> (B,k,L//Q,Q) is a free view) maximising vreg
    utilisation of the (L//Q, Q) plane.  Lane utilisation penalises Q that is
    not a multiple of 128; sublane utilisation penalises L//Q < 8."""
    lane = 128
    best_key, best_q = None, 1
    for q in _divisors(L):
        p = L // q
        lane_tiles = -(-q // lane)
        # The smallest usable block (8 rows, all k chunks, 2-in + 2-out
        # double buffered) must stay comfortably inside VMEM.
        min_resident = 4 * k * 8 * lane_tiles * lane * itemsize
        if min_resident > 8 * 1024 * 1024:
            continue
        util = (q / (lane_tiles * lane)) * (min(p, 8) / 8.0)
        key = (util, -abs(q - 512))          # tie-break: moderate row length
        if best_key is None or key > best_key:
            best_key, best_q = key, q
    return best_q


def _hw_budgets():
    """(resident-VMEM budget for the 4 double-buffered blocks, row-tile cap,
    explicit vmem_limit_bytes or None) per TPU generation."""
    try:
        kind = jax.devices()[0].device_kind.lower()
    except Exception:  # pragma: no cover - defensive
        kind = ""
    if "v2" in kind or "v3" in kind:
        return 6 << 20, 512, None
    if "v5 lite" in kind or "v5e" in kind or "v5litepod" in kind:
        # Stay inside v5e's 16 MiB scoped-VMEM default; no flag needed.
        return 12 << 20, 1024, None
    # v6e / v7x / v5p / v4 / unknown: larger tiles amortise the ~0.35us
    # per-grid-step cost; make the scoped-VMEM limit explicit.
    return 16 << 20, 2048, 32 << 20


def _topk_fmap_kernel(x_ref, o_ref, *, k, sub, unroll, comparators):
    """Block shapes: (bb, k, t_p, Q).  Sort descending across the k axis,
    elementwise over the (t_p, Q) plane, one vreg-sized row group at a time."""
    bb = x_ref.shape[0]
    t_p = x_ref.shape[2]
    n_full = t_p // sub          # static
    rem = t_p - n_full * sub     # static

    def sort_rows(rows):
        # Oblivious sorting network; max to the lower index => descending.
        for (i0, i1) in comparators:
            hi = jnp.maximum(rows[i0], rows[i1])
            lo = jnp.minimum(rows[i0], rows[i1])
            rows[i0], rows[i1] = hi, lo
        return rows

    for b in range(bb):  # bb == 1 except for tiny batched-fold problems
        if n_full > 0:
            def body(c, carry):
                r0 = pl.multiple_of(c * sub, sub)
                # k vreg-sized (sub, Q) row groups stay register-resident for
                # the whole compare/exchange network.
                rows = sort_rows([x_ref[b, i, pl.ds(r0, sub), :] for i in range(k)])
                for i in range(k):
                    o_ref[b, i, pl.ds(r0, sub), :] = rows[i]
                return carry

            # Partial unroll: bounded live ranges / vreg pressure even when
            # the row tile is large (n_full up to ~256).
            lax.fori_loop(0, n_full, body, 0, unroll=min(unroll, n_full))
        if rem:
            r0 = n_full * sub
            rows = sort_rows([x_ref[b, i, pl.ds(r0, rem), :] for i in range(k)])
            for i in range(k):
                o_ref[b, i, pl.ds(r0, rem), :] = rows[i]


def topk_feature_map(x, k, *, max_block_rows=None):
    """Pallas implementation of TopKFeatureMap.forward for NCHW input x."""
    B, C, H, W = x.shape
    if C % k != 0:
        raise ValueError("channels must be divisible by k")
    G = C // k
    L = G * H * W
    lane = 128
    itemsize = jnp.dtype(x.dtype).itemsize
    sub = max(8, 32 // itemsize)  # sublanes per native vreg tile (f32: 8, bf16: 16)

    # Copy-free layout: (B, C, H, W) -> (B, k, P, Q), pure reshape (chunk m,
    # within-chunk channel j maps to input channel m*G + j, matching
    # torch.chunk(x, k, dim=1)).
    Q = _choose_lane_dim(L, k, itemsize)
    P = L // Q
    lane_tiles = -(-Q // lane)
    row_bytes = k * lane_tiles * lane * itemsize  # one sublane row, all k chunks

    budget, cap_rows, vmem_limit = _hw_budgets()
    max_rows = max(sub, (budget // (4 * row_bytes)) // sub * sub)
    t_p_cap = min(cap_rows, max_rows)
    if max_block_rows is not None:  # testing hook to force the multi-tile path
        t_p_cap = min(t_p_cap, max(sub, (max_block_rows // sub) * sub))

    if P <= t_p_cap:
        t_p, n_tiles = P, 1                     # full dim (any value allowed)
    else:
        t_p = t_p_cap                           # multiple of `sub` (>= 8)
        n_tiles = -(-P // t_p)                  # ragged last block, no round-up

    # Tiny problems: group batch elements per block to amortise the ~0.35us
    # per-grid-step cost, but keep >= 2 parallel grid points so v7x's two
    # TensorCores both get work.
    bb = 1
    if n_tiles == 1 and B > 1:
        per_b = k * (-(-t_p // 8) * 8) * lane_tiles * lane * itemsize
        if per_b <= 256 * 1024:
            target = max(1, B // 2)
            target = min(target, max(1, (budget // 4) // per_b))
            bb = max(d for d in range(1, target + 1) if B % d == 0)

    x4 = x.reshape(B, k, P, Q)  # zero-copy view

    kernel = functools.partial(
        _topk_fmap_kernel, k=k, sub=sub, unroll=8,
        comparators=_batcher_comparators(k),
    )
    out = pl.pallas_call(
        kernel,
        out_shape=jax.ShapeDtypeStruct((B, k, P, Q), x.dtype),
        grid=(B // bb, n_tiles),
        in_specs=[pl.BlockSpec((bb, k, t_p, Q), lambda b, t: (b, 0, t, 0))],
        out_specs=pl.BlockSpec((bb, k, t_p, Q), lambda b, t: (b, 0, t, 0)),
        compiler_params=pltpu.CompilerParams(
            dimension_semantics=("parallel", "parallel"),
            vmem_limit_bytes=vmem_limit,
        ),
    )(x4)

    # out[b, i, p, q] = i-th largest -> output channel i*G + j: plain reshape.
    return out.reshape(B, C, H, W)


def _reference(x, k):
    B, C, H, W = x.shape
    G = C // k
    xr = x.reshape(B, k, G, H * W)
    return (-jnp.sort(-xr, axis=1)).reshape(B, C, H, W)


if __name__ == "__main__":
    # Module params: TopKFeatureMap(n=1, k=4)  (assert k % n == 0 holds).
    n, k = 1, 4
    assert k % n == 0

    key = jax.random.PRNGKey(0)

    # Main config: B=2, C=8 (G=2), 16x16 spatial, f32 (lane-aligned, 1 tile).
    x = jax.random.normal(key, (2, 8, 16, 16), dtype=jnp.float32)
    y = jax.block_until_ready(topk_feature_map(x, k))
    assert y.shape == x.shape and y.dtype == x.dtype
    assert jnp.allclose(y, _reference(x, k)), "mismatch vs reference (main)"

    # Ragged lane dim (G*H*W = 784 not a multiple of 128) and k=3 network:
    # handled with zero wrapper copies (Q=112 rows).
    x2 = jax.random.normal(jax.random.PRNGKey(0), (2, 12, 14, 14), dtype=jnp.float32)
    y2 = jax.block_until_ready(topk_feature_map(x2, 3))
    assert jnp.allclose(y2, _reference(x2, 3)), "mismatch vs reference (ragged/k=3)"

    # Multi-tile grid with a ragged last row block (P=9, t_p=8 -> 2 tiles).
    x3 = jax.random.normal(jax.random.PRNGKey(0), (2, 8, 24, 24), dtype=jnp.float32)
    y3 = jax.block_until_ready(topk_feature_map(x3, 4, max_block_rows=8))
    assert jnp.allclose(y3, _reference(x3, 4)), "mismatch vs reference (tiled/ragged)"

    # Larger aligned case exercising the partially-unrolled fori_loop path.
    x4 = jax.random.normal(jax.random.PRNGKey(0), (1, 8, 64, 64), dtype=jnp.float32)
    y4 = jax.block_until_ready(topk_feature_map(x4, 4))
    assert jnp.allclose(y4, _reference(x4, 4)), "mismatch vs reference (unrolled)"

    # bf16 path: data stays bf16 end to end (sub=16 sublane tiles).
    x5 = jax.random.normal(jax.random.PRNGKey(0), (2, 8, 16, 16), dtype=jnp.bfloat16)
    y5 = jax.block_until_ready(topk_feature_map(x5, 4))
    assert y5.dtype == jnp.bfloat16
    assert jnp.allclose(y5, _reference(x5, 4)), "mismatch vs reference (bf16)"

    print("KERNEL_OK")
</pallas_src>

<mosaic_0001>
module attributes {stable_mosaic.version = 11 : i64} {
  func.func @_topk_fmap_kernel(%arg0: i32, %arg1: i32, %arg2: memref<1x4x4x128xf32, #tpu.memory_space<vmem>>, %arg3: memref<1x4x4x128xf32, #tpu.memory_space<vmem>>) attributes {dimension_semantics = [#tpu.dimension_semantics<parallel>, #tpu.dimension_semantics<parallel>], iteration_bounds = array<i64: 2, 1>, scalar_prefetch = 0 : i64, scratch_operands = 0 : i64, tpu.core_type = #tpu.core_type<tc>, window_params = [{transform_indices = @transform_0, window_bounds = array<i64: 1, 4, 4, 128>}, {transform_indices = @transform_1, window_bounds = array<i64: 1, 4, 4, 128>}]} {
    %c0 = arith.constant 0 : index
    %c0_0 = arith.constant 0 : index
    %c0_1 = arith.constant 0 : index
    %c0_2 = arith.constant 0 : index
    %0 = vector.load %arg2[%c0, %c0_0, %c0_1, %c0_2] : memref<1x4x4x128xf32, #tpu.memory_space<vmem>>, vector<1x1x4x128xf32>
    %1 = vector.shape_cast %0 : vector<1x1x4x128xf32> to vector<4x128xf32>
    %c0_3 = arith.constant 0 : index
    %c1 = arith.constant 1 : index
    %c0_4 = arith.constant 0 : index
    %c0_5 = arith.constant 0 : index
    %2 = vector.load %arg2[%c0_3, %c1, %c0_4, %c0_5] : memref<1x4x4x128xf32, #tpu.memory_space<vmem>>, vector<1x1x4x128xf32>
    %3 = vector.shape_cast %2 : vector<1x1x4x128xf32> to vector<4x128xf32>
    %c0_6 = arith.constant 0 : index
    %c2 = arith.constant 2 : index
    %c0_7 = arith.constant 0 : index
    %c0_8 = arith.constant 0 : index
    %4 = vector.load %arg2[%c0_6, %c2, %c0_7, %c0_8] : memref<1x4x4x128xf32, #tpu.memory_space<vmem>>, vector<1x1x4x128xf32>
    %5 = vector.shape_cast %4 : vector<1x1x4x128xf32> to vector<4x128xf32>
    %c0_9 = arith.constant 0 : index
    %c3 = arith.constant 3 : index
    %c0_10 = arith.constant 0 : index
    %c0_11 = arith.constant 0 : index
    %6 = vector.load %arg2[%c0_9, %c3, %c0_10, %c0_11] : memref<1x4x4x128xf32, #tpu.memory_space<vmem>>, vector<1x1x4x128xf32>
    %7 = vector.shape_cast %6 : vector<1x1x4x128xf32> to vector<4x128xf32>
    %8 = arith.maximumf %1, %3 : vector<4x128xf32>
    %9 = arith.minimumf %1, %3 : vector<4x128xf32>
    %10 = arith.maximumf %5, %7 : vector<4x128xf32>
    %11 = arith.minimumf %5, %7 : vector<4x128xf32>
    %12 = arith.maximumf %8, %10 : vector<4x128xf32>
    %13 = arith.minimumf %8, %10 : vector<4x128xf32>
    %14 = arith.maximumf %9, %11 : vector<4x128xf32>
    %15 = arith.minimumf %9, %11 : vector<4x128xf32>
    %16 = arith.maximumf %14, %13 : vector<4x128xf32>
    %17 = arith.minimumf %14, %13 : vector<4x128xf32>
    %c0_12 = arith.constant 0 : index
    %c0_13 = arith.constant 0 : index
    %c0_14 = arith.constant 0 : index
    %c0_15 = arith.constant 0 : index
    %18 = vector.load %arg3[%c0_12, %c0_13, %c0_14, %c0_15] : memref<1x4x4x128xf32, #tpu.memory_space<vmem>>, vector<1x1x4x128xf32>
    %19 = vector.shape_cast %18 : vector<1x1x4x128xf32> to vector<4x128xf32>
    %20 = vector.shape_cast %12 : vector<4x128xf32> to vector<1x1x4x128xf32>
    tpu.vector_store %arg3[%c0_12, %c0_13, %c0_14, %c0_15], %20 {strides = array<i32>} : memref<1x4x4x128xf32, #tpu.memory_space<vmem>>, vector<1x1x4x128xf32>,
    %c0_16 = arith.constant 0 : index
    %c1_17 = arith.constant 1 : index
    %c0_18 = arith.constant 0 : index
    %c0_19 = arith.constant 0 : index
    %21 = vector.load %arg3[%c0_16, %c1_17, %c0_18, %c0_19] : memref<1x4x4x128xf32, #tpu.memory_space<vmem>>, vector<1x1x4x128xf32>
    %22 = vector.shape_cast %21 : vector<1x1x4x128xf32> to vector<4x128xf32>
    %23 = vector.shape_cast %16 : vector<4x128xf32> to vector<1x1x4x128xf32>
    tpu.vector_store %arg3[%c0_16, %c1_17, %c0_18, %c0_19], %23 {strides = array<i32>} : memref<1x4x4x128xf32, #tpu.memory_space<vmem>>, vector<1x1x4x128xf32>,
    %c0_20 = arith.constant 0 : index
    %c2_21 = arith.constant 2 : index
    %c0_22 = arith.constant 0 : index
    %c0_23 = arith.constant 0 : index
    %24 = vector.load %arg3[%c0_20, %c2_21, %c0_22, %c0_23] : memref<1x4x4x128xf32, #tpu.memory_space<vmem>>, vector<1x1x4x128xf32>
    %25 = vector.shape_cast %24 : vector<1x1x4x128xf32> to vector<4x128xf32>
    %26 = vector.shape_cast %17 : vector<4x128xf32> to vector<1x1x4x128xf32>
    tpu.vector_store %arg3[%c0_20, %c2_21, %c0_22, %c0_23], %26 {strides = array<i32>} : memref<1x4x4x128xf32, #tpu.memory_space<vmem>>, vector<1x1x4x128xf32>,
    %c0_24 = arith.constant 0 : index
    %c3_25 = arith.constant 3 : index
    %c0_26 = arith.constant 0 : index
    %c0_27 = arith.constant 0 : index
    %27 = vector.load %arg3[%c0_24, %c3_25, %c0_26, %c0_27] : memref<1x4x4x128xf32, #tpu.memory_space<vmem>>, vector<1x1x4x128xf32>
    %28 = vector.shape_cast %27 : vector<1x1x4x128xf32> to vector<4x128xf32>
    %29 = vector.shape_cast %15 : vector<4x128xf32> to vector<1x1x4x128xf32>
    tpu.vector_store %arg3[%c0_24, %c3_25, %c0_26, %c0_27], %29 {strides = array<i32>} : memref<1x4x4x128xf32, #tpu.memory_space<vmem>>, vector<1x1x4x128xf32>,
    return
  }
  func.func @transform_0(%arg0: i32, %arg1: i32) -> (i32, i32, i32, i32) {
    %c0_i32 = arith.constant 0 : i32
    %c0_i32_0 = arith.constant 0 : i32
    %c0_i32_1 = arith.constant 0 : i32
    return %arg0, %c0_i32, %arg1, %c0_i32_0 : i32, i32, i32, i32
  }
  func.func @transform_1(%arg0: i32, %arg1: i32) -> (i32, i32, i32, i32) {
    %c0_i32 = arith.constant 0 : i32
    %c0_i32_0 = arith.constant 0 : i32
    %c0_i32_1 = arith.constant 0 : i32
    return %arg0, %c0_i32, %arg1, %c0_i32_0 : i32, i32, i32, i32
  }
}

</mosaic_0001>

<bundles_post_ra>
// kernel: tpu_custom_call.1
= control target key start
LH: loop header
LB: loop body
LE: loop exit
PB: predicated region body
PF: predicated region fallthrough
CT: control target
= control target key end

     0   :  { %6 = vsyncpa [#allocation3], 0  ;;  %s637_s0 = inlined_call_operand.hbm [shape: f32[2,4,4,128], index: 0, kind: input, shape index: {}]   ;;  %s638_s1 = inlined_call_operand.hbm [shape: f32[2,4,4,128], index: 1, kind: output, shape index: {}]  }
   0x1   :  { %8 = vsyncpa [#allocation3 + $0x1], 0 }
   0x2   :  { %9 = vsyncpa [#allocation4], 0 }
   0x3   :  { %11 = vsyncpa [#allocation4 + $0x1], 0  ;;  %s491_s6 = smov 0   ;;  %s493_s7 = smov 0  }
   0x4   :  { %s495_s8 = smov 0   ;;  %s497_s9 = smov 0  }
   0x5   :  { %s499_s10 = smov 0   ;;  %s501_s11 = smov 0  }
   0x6 LB: > { %s276_s12 = sadd.s32 4294967295, %s473_s11   ;;  %s277_s13 = sadd.s32 4294967294, %s473_s11   ;;  %s473_s11 = sphi %s501_s11, %s17_s11   ;;  %s469_s10 = sphi %s499_s10, %s649_s10   ;;  %s465_s9 = sphi %s497_s9, %s648_s9   ;;  %s461_s8 = sphi %s495_s8, %s647_s8   ;;  %s457_s7 = sphi %s493_s7, %s646_s7   ;;  %s453_s6 = sphi %s491_s6, %s645_s6  }
   0x7   : > { %s29_s14 = sadd.s32 1, %s469_s10  ;;  %s38_s15 = sadd.s32 1, %s461_s8 }
   0x8   : > { %p31_p0 = scmp.ge.s32.totalorder %s29_s14, 2  ;;  %p45_p1 = scmp.ne.s32.totalorder %s461_s8, %s457_s7 }
   0x9   : > { %p46_p2 = scmp.eq.s32.totalorder %s473_s11, 0  ;;  %p51_p3 = scmp.ne.s32.totalorder %s457_s7, %s453_s6 }
   0xa   : > { %s651_s14 = smov (%p31_p0, %s29_s14), 0  ;;  %p52_p5 = scmp.eq.s32.totalorder %s276_s12, 0 }
   0xb   : > { %p532_p4 = por %p46_p2, %p45_p1  ;;  %s33_s17 = ssub.s32 %s469_s10, %s651_s14 }
   0xc   : > { %p77_p6 = scmp.eq.s32.totalorder %s276_s12, 1  ;;  %p36_p7 = scmp.eq.s32.totalorder %s33_s17, 0 }
   0xd   : > { %p538_p8 = por %p52_p5, %p51_p3  ;;  %p83_p10 = scmp.eq.s32.totalorder %s277_s13, 1 }
   0xe   : > { %p542_p9 = por %p77_p6, %p45_p1  ;;  %p311_p13 = scmp.lt.s32.totalorder %s473_s11, 2 }
   0xf   : > { %s547_s20 = scalar_select %p36_p7, %s461_s8, %s38_s15  }
  0x10   : > { %p549_p11 = por %p83_p10, %p51_p3  ;;  %s103_s22 = sand.u32 1, %s461_s8  }
  0x11   : > { %s280_s23 = sshll.u32 %s103_s22, 4  ;;  %s297_s24 = sshll.u32 %s469_s10, 8 }
  0x12   : > { %s114_s27 = scalar_lea.hbm %s637_s0, %s297_s24  ;;  %s107_s28 = scalar_lea.vmem [#allocation2], %s280_s23 }
  0x13   : > { %s115_s29 = sshll.u32 %s107_s28, 4  ;;  %p562_p0 = pnand %p311_p13, %p532_p4  ;;  %s116_s29 = int_to_ptr.vmem [resolvable:$true] %s115_s29 }
  0x14   : > { %p283_p1 = scmp.ge.s32.totalorder %s473_s11, 1  ;;  %s104_s2 = scalar_lea.sflag [#allocation3], %s103_s22 }
  0x15   : > { %p367_p2 = pneg %p562_p0  ;;  %s378_s3 = scalar_lea.vmem %s116_s29, 256 }
  0x16   : > { %p379_p3 = scmp.ne.s32.totalorder %s116_s29, %s378_s3  ;;  %s475_s4 = smov [#allocation2]  }
  0x17   : > { %s383_s5 = sshll.u32 %s475_s4, 4  ;;  %s384_s5 = int_to_ptr.vmem [resolvable:$false] %s383_s5 }
  0x18   : > { %p381_p5 = pnand %p379_p3, %p367_p2  ;;  %s385_s12 = scalar_lea.vmem %s384_s5, 512 }
  0x19   : > { %p386_p7 = scmp.lt.s32.totalorder %s116_s29, %s384_s5  ;;  %p387_p10 = scmp.lt.s32.totalorder %s385_s12, %s378_s3 }
  0x1a   : > { %p382_p6 = pneg %p381_p5 }
  0x1b   : > { %p388_p12 = por %p387_p10, %p386_p7 }
  0x1d   : > { %p389_p4 = pnand %p388_p12, %p382_p6 }
  0x1f   : > { %392 = shalt.err (!%p389_p4)
}
  0x20   : > { %s476_s13 = smov 64   ;;  %s477_s15 = smov 4  }
  0x21   : > { %306 = dma.hbm_to_vmem [thread:$0]  (!%p562_p0), %s114_s27, 256, %s116_s29, %s104_s2, %s476_s13, %s476_s13, %s477_s15  }
  0x22   : > { %p123_p13 = scmp.lt.s32.totalorder %s473_s11, 3 }
  0x24   : > { %p124_p2 = pnand %p283_p1, %p123_p13 }
  0x25   : > { %s575_s16 = sand.u32 (!%p124_p2), 1, %s457_s7  }
  0x26   : > { %127 = sbr.rel (%p124_p2) target bundleno = 69 (0x45), region = 24  ;;  %s284_s17 = sshll.u32 (!%p124_p2), %s575_s16, 4 }
  0x27   : > { %s130_s22 = scalar_lea.sflag (!%p124_p2), [#allocation3], %s575_s16  ;;  %s133_s23 = scalar_lea.vmem (!%p124_p2), [#allocation2], %s284_s17 }
  0x2b   : > { %444 = dma.done.wait (%p538_p8), %s130_s22, 256  }
  0x2c   : > { %446 = vsyncadd (%p538_p8), %s130_s22, 4294967040  ;;  %v152_v0 = vld [vmem:[%s133_s23] sm:$0xf]  ;;  %v286_v1 = vld [vmem:[%s133_s23 + $0x4] sm:$0xf]  ;;  %s151_s24 = scalar_lea.vmem [#allocation5], %s284_s17 }
  0x2d   : > { %v287_v2 = vld [vmem:[%s133_s23 + $0x8] sm:$0xf]  ;;  %v288_v3 = vld [vmem:[%s133_s23 + $0xc] sm:$0xf]  ;;  %v159_v4 = vmax.f32 %v152_v0, %v286_v1  ;;  %v160_v5 = vmin.f32 %v152_v0, %v286_v1  ;;  %s191_s25 = sshll.u32 %s151_s24, 4  ;;  %s298_s26 = sshll.u32 %s465_s9, 8  ;;  %s584_s25 = int_to_ptr.vmem [resolvable:$true] %s191_s25 }
  0x2e   : > { %v161_v6 = vmax.f32 %v287_v2, %v288_v3  ;;  %v162_v7 = vmin.f32 %v287_v2, %v288_v3  ;;  %s589_s28 = scalar_lea.hbm %s638_s1, %s298_s26  ;;  %s177_s9 = scalar_lea.sflag [#allocation4], %s575_s16 }
  0x2f   : > { %s393_s29 = scalar_lea.vmem %s584_s25, 256  ;;  %s478_s30 = smov [#allocation5]  }
  0x30   : > { %v163_v8 = vmax.f32 %v159_v4, %v161_v6  ;;  %v164_v9 = vmin.f32 %v159_v4, %v161_v6  ;;  %v165_v10 = vmax.f32 %v160_v5, %v162_v7  ;;  %v166_v11 = vmin.f32 %v160_v5, %v162_v7  ;;  %p394_p8 = scmp.ne.s32.totalorder %s584_s25, %s393_s29  ;;  %s397_s2 = sshll.u32 %s478_s30, 4  ;;  %s398_s2 = int_to_ptr.vmem [resolvable:$false] %s397_s2 }
  0x31   : > { %s399_s3 = scalar_lea.vmem %s398_s2, 512  ;;  %p400_p1 = scmp.lt.s32.totalorder %s584_s25, %s398_s2 }
  0x32   : > { %169 = vst [vmem:[%s151_s24] sm:$0xf] %v163_v8  ;;  %v167_v12 = vmax.f32 %v165_v10, %v164_v9  ;;  %v168_v13 = vmin.f32 %v165_v10, %v164_v9  ;;  %291 = vst [vmem:[%s151_s24 + $0xc] sm:$0xf] %v166_v11  ;;  %p395_p12 = pnand %p394_p8, %p542_p9  ;;  %p401_p3 = scmp.lt.s32.totalorder %s399_s3, %s393_s29 }
  0x34   : > { %289 = vst [vmem:[%s151_s24 + $0x4] sm:$0xf] %v167_v12  ;;  %290 = vst [vmem:[%s151_s24 + $0x8] sm:$0xf] %v168_v13  ;;  %p396_p0 = pneg %p395_p12  ;;  %p402_p5 = por %p401_p3, %p400_p1 }
  0x36   : > { %p403_p6 = pnand %p402_p5, %p396_p0 }
  0x38   : > { %406 = shalt.err (!%p403_p6)
}
  0x39   : > { %s407_s4 = scalar_lea.hbm %s589_s28, 256  ;;  %s411_s13 = scalar_lea.hbm %s638_s1, 512 }
  0x3a   : > { %p408_p7 = scmp.ne.s32.totalorder %s589_s28, %s407_s4  ;;  %p412_p13 = scmp.lt.s32.totalorder %s589_s28, %s638_s1 }
  0x3b   : > { %p413_p2 = scmp.lt.s32.totalorder %s411_s13, %s407_s4 }
  0x3c   : > { %p409_p10 = pnand %p408_p7, %p542_p9 }
  0x3d   : > { %p414_p8 = por %p413_p2, %p412_p13 }
  0x3e   : > { %p410_p4 = pneg %p409_p10 }
  0x40   : > { %p415_p12 = pnand %p414_p8, %p410_p4 }
  0x42   : > { %418 = shalt.err (!%p415_p12)
}
  0x43   : > { %s479_s22 = smov 64   ;;  %s480_s23 = smov 4  }
  0x44   : > { %301 = dma.vmem_to_hbm [thread:$0]  (%p542_p9), %s584_s25, 256, %s589_s28, %s177_s9, %s479_s22, %s479_s22, %s480_s23  }
  0x45 PF: > { %s206_s24 = sand.u32 1, %s453_s6   ;;  %p644_p0 = scmp.ge.s32.totalorder %s473_s11, 2 }
  0x46   : > { %s207_s26 = scalar_lea.sflag [#allocation4], %s206_s24 }
  0x47   : > { %p308_p1 = pnand %p644_p0, %p549_p11 }
  0x49   : > { %p309_p3 = pneg %p308_p1 }
  0x4b   : > { %448 = dma.done.wait (%p309_p3), %s207_s26, 256  }
  0x4c   : > { %450 = vsyncadd (%p309_p3), %s207_s26, 4294967040  ;;  %s17_s11 = sadd.s32 1, %s473_s11   ;;  %s645_s6 = smov %s457_s7 }
  0x4d   : > { %p14_p5 = scmp.ge.s32.totalorder %s17_s11, 4   ;;  %s646_s7 = smov %s461_s8 }
  0x4e   : > { %s647_s8 = smov %s547_s20  ;;  %s648_s9 = smov %s469_s10 }
  0x4f   : > { %s649_s10 = smov %s651_s14  ;;  %16 = sbr.rel (!%p14_p5) target bundleno = 6 (0x6), region = 75 }
  0x54   :  { %212 = vsyncpa [#allocation3], 1 }
  0x55   :  { %214 = vsyncpa [#allocation3 + $0x1], 1 }
  0x56   :  { %215 = vsyncpa [#allocation4], 1 }
  0x57   :  { %217 = vsyncpa [#allocation4 + $0x1], 1 }

</bundles_post_ra>
